<compile_context>
chip_gen: v7x
topology: tpu7x:2x2x1
jax: 0.10.0
libtpu: 0.0.40
codegen_flags: <defaults>
</compile_context>

<pallas_src>
import math

import jax
import jax.numpy as jnp
from jax.experimental import pallas as pl
from jax.experimental.pallas import tpu as pltpu


def _round_up(n, m):
    return ((n + m - 1) // m) * m


def _new_gelu(x):
    # NewGELUActivation: 0.5*x*(1 + tanh(sqrt(2/pi)*(x + 0.044715*x^3)))
    c = math.sqrt(2.0 / math.pi)
    return 0.5 * x * (1.0 + jnp.tanh(c * (x + 0.044715 * x * x * x)))


def _t5_layernorm(x, gamma, eps=1e-6):
    # T5LayerNorm: RMS norm (no mean subtraction), variance in fp32,
    # cast back to the weight dtype when the weight is half precision.
    xf = x.astype(jnp.float32)
    var = jnp.mean(xf * xf, axis=-1, keepdims=True)
    h = x * jax.lax.rsqrt(var + eps)
    if gamma.dtype in (jnp.bfloat16, jnp.float16):
        h = h.astype(gamma.dtype)
    return gamma * h


def _dense_norm_act(x, w_ref, b_ref, g_ref):
    """Linear -> T5LayerNorm -> NewGELU -> Dropout(identity, eval mode)."""
    w = w_ref[...]
    h = jnp.dot(x, w, preferred_element_type=jnp.float32)
    h = h + b_ref[...].astype(jnp.float32)
    # PyTorch Linear output dtype == weight dtype (keeps later matmuls on the
    # fast bf16 MXU path when params are bf16; no-op for fp32).
    h = h.astype(w.dtype)
    h = _t5_layernorm(h, g_ref[...])
    h = _new_gelu(h)
    # TODO(synk): nn.Dropout is identity in eval mode; training-mode RNG dropout
    # is not implemented.
    return h


def _head_kernel(x_ref,
                 w0_ref, b0_ref, g0_ref,
                 w1_ref, b1_ref, g1_ref,
                 w2_ref, b2_ref, g2_ref,
                 wo_ref, bo_ref,
                 out_ref):
    h = _dense_norm_act(x_ref[...], w0_ref, b0_ref, g0_ref)
    h = _dense_norm_act(h, w1_ref, b1_ref, g1_ref)
    h = _dense_norm_act(h, w2_ref, b2_ref, g2_ref)

    # out_proj (padded only to a multiple-of-8 sublane width; extra cols zero).
    out = jnp.dot(h, wo_ref[...], preferred_element_type=jnp.float32)
    out = out + bo_ref[...].astype(jnp.float32)
    out_ref[...] = out.astype(out_ref.dtype)


def prepare_params(params):
    """Hoisted out of the hot path: pad out_proj weight/bias to a multiple of 8
    output columns once (instead of per call)."""
    if "wo_p" in params and "bo_p" in params:
        return params
    wo, bo = params["wo"], params["bo"]
    num_labels = wo.shape[1]
    out_pad = _round_up(max(num_labels, 1), 8)
    dtype = wo.dtype
    wo_p = jnp.zeros((wo.shape[0], out_pad), dtype).at[:, :num_labels].set(wo)
    bo_p = jnp.zeros((1, out_pad), dtype).at[:, :num_labels].set(bo)
    prepared = dict(params)
    prepared["wo_p"] = wo_p
    prepared["bo_p"] = bo_p
    return prepared


def t5_classification_head(x, params, *, tb=None, target_tile=2048):
    """x: [B, d_model]. params: dict of weights (see init_params / prepare_params)."""
    params = prepare_params(params)

    B, d_model = x.shape
    dtype = x.dtype
    num_labels = int(params["wo"].shape[1])
    wo_p, bo_p = params["wo_p"], params["bo_p"]
    out_pad = int(wo_p.shape[1])
    d0 = int(params["w0"].shape[1])
    d1 = int(params["w1"].shape[1])
    d2 = int(params["w2"].shape[1])

    # Batch tile: near target_tile for HBM-stream amortization, >=2 grid steps
    # when possible (both v7x TensorCores engage), multiple of 8 sublanes, and
    # padding waste bounded to <8 rows per tile.
    if tb is None:
        steps = max(2, pl.cdiv(B, target_tile))
        tb = _round_up(pl.cdiv(B, steps), 8)
    else:
        tb = _round_up(tb, 8)
    B_pad = _round_up(B, tb)
    if B_pad != B:
        x = jnp.pad(x, ((0, B_pad - B), (0, 0)))
    grid = (B_pad // tb,)

    weights = (
        params["w0"], params["b0"], params["g0"],
        params["w1"], params["b1"], params["g1"],
        params["w2"], params["b2"], params["g2"],
        wo_p, bo_p,
    )

    # x tile streams per grid step; params pinned in VMEM via constant index map.
    # (At production d_model, add pipeline_mode=pl.Buffered(1) to the constant
    #  weight specs to halve their VMEM footprint.)
    in_specs = [pl.BlockSpec((tb, d_model), lambda i: (i, 0))]
    in_specs += [pl.BlockSpec(w.shape, lambda i: (0, 0)) for w in weights]

    param_bytes = sum(int(w.size) * w.dtype.itemsize for w in weights)
    in_bytes = B_pad * d_model * x.dtype.itemsize
    out_bytes = B_pad * out_pad * jnp.dtype(dtype).itemsize

    # Explicit scoped-VMEM limit: double-buffered x/out tiles + (double-buffered)
    # params + fp32 intermediates + headroom; >=32 MiB so large tiles also fit
    # on v5e (16 MiB default scoped VMEM).
    vmem_est = (2 * (tb * d_model * x.dtype.itemsize
                     + tb * out_pad * jnp.dtype(dtype).itemsize)
                + 2 * param_bytes
                + tb * (d0 + d1 + d2) * 4
                + (4 << 20))
    vmem_limit = int(min(max(vmem_est, 32 << 20), 64 << 20))

    flops = 2 * B_pad * (d_model * d0 + d0 * d1 + d1 * d2 + d2 * out_pad)
    transcendentals = B_pad * (d0 + d1 + d2 + 3)  # tanh per GELU elem + 3 rsqrt/row

    out = pl.pallas_call(
        _head_kernel,
        out_shape=jax.ShapeDtypeStruct((B_pad, out_pad), dtype),
        grid=grid,
        in_specs=in_specs,
        out_specs=pl.BlockSpec((tb, out_pad), lambda i: (i, 0)),
        compiler_params=pltpu.CompilerParams(
            dimension_semantics=("parallel",),
            vmem_limit_bytes=vmem_limit),
        cost_estimate=pl.CostEstimate(
            flops=flops,
            transcendentals=transcendentals,
            bytes_accessed=in_bytes + out_bytes + param_bytes),
    )(x, *weights)

    return out[:B, :num_labels]


def init_params(key, d_model, num_labels, dtype=jnp.float32):
    d0, d1, d2 = d_model // 4, d_model // 16, d_model // 64
    ks = jax.random.split(key, 8)

    def lin(kw, kb, fin, fout):
        bound = 1.0 / math.sqrt(fin)
        w = jax.random.uniform(kw, (fin, fout), dtype, -bound, bound)
        b = jax.random.uniform(kb, (1, fout), dtype, -bound, bound)
        return w, b

    w0, b0 = lin(ks[0], ks[1], d_model, d0)
    w1, b1 = lin(ks[2], ks[3], d0, d1)
    w2, b2 = lin(ks[4], ks[5], d1, d2)
    wo, bo = lin(ks[6], ks[7], d2, num_labels)
    return {
        "w0": w0, "b0": b0, "g0": jnp.ones((1, d0), dtype),
        "w1": w1, "b1": b1, "g1": jnp.ones((1, d1), dtype),
        "w2": w2, "b2": b2, "g2": jnp.ones((1, d2), dtype),
        "wo": wo, "bo": bo,
    }


def _reference(x, p):
    def block(h, w, b, g):
        h = h @ w + b
        h = _t5_layernorm(h, g)
        return _new_gelu(h)

    h = block(x, p["w0"], p["b0"], p["g0"])
    h = block(h, p["w1"], p["b1"], p["g1"])
    h = block(h, p["w2"], p["b2"], p["g2"])
    return h @ p["wo"] + p["bo"]


if __name__ == "__main__":
    key = jax.random.PRNGKey(0)
    k_x, k_p = jax.random.split(key)

    batch = 12         # non-multiple of 8 -> exercises pad/slice path and a 2-step grid
    d_model = 256      # small config: 256 -> 64 -> 16 -> 4
    num_labels = 3

    x = jax.random.normal(k_x, (batch, d_model), jnp.float32)
    params = init_params(k_p, d_model, num_labels)
    prepared = prepare_params(params)   # out_proj padding hoisted out of hot path

    out = t5_classification_head(x, prepared)
    out = jax.block_until_ready(out)

    ref = _reference(x, params)
    assert out.shape == (batch, num_labels)
    assert jnp.allclose(out, ref, atol=1e-4, rtol=1e-4), "mismatch vs reference"

    print("KERNEL_OK")
</pallas_src>

<mosaic_0001>
module attributes {stable_mosaic.version = 11 : i64} {
  func.func @_head_kernel(%arg0: i32, %arg1: memref<8x256xf32, #tpu.memory_space<vmem>>, %arg2: memref<256x64xf32, #tpu.memory_space<vmem>>, %arg3: memref<1x64xf32, #tpu.memory_space<vmem>>, %arg4: memref<1x64xf32, #tpu.memory_space<vmem>>, %arg5: memref<64x16xf32, #tpu.memory_space<vmem>>, %arg6: memref<1x16xf32, #tpu.memory_space<vmem>>, %arg7: memref<1x16xf32, #tpu.memory_space<vmem>>, %arg8: memref<16x4xf32, #tpu.memory_space<vmem>>, %arg9: memref<1x4xf32, #tpu.memory_space<vmem>>, %arg10: memref<1x4xf32, #tpu.memory_space<vmem>>, %arg11: memref<4x8xf32, #tpu.memory_space<vmem>>, %arg12: memref<1x8xf32, #tpu.memory_space<vmem>>, %arg13: memref<8x8xf32, #tpu.memory_space<vmem>>) attributes {dimension_semantics = [#tpu.dimension_semantics<parallel>], iteration_bounds = array<i64: 2>, scalar_prefetch = 0 : i64, scratch_operands = 0 : i64, tpu.core_type = #tpu.core_type<tc>, window_params = [{transform_indices = @transform_0, window_bounds = array<i64: 8, 256>}, {pipeline_mode = #tpu.pipeline_mode<synchronous>, transform_indices = @transform_1, window_bounds = array<i64: 256, 64>}, {pipeline_mode = #tpu.pipeline_mode<synchronous>, transform_indices = @transform_2, window_bounds = array<i64: 1, 64>}, {pipeline_mode = #tpu.pipeline_mode<synchronous>, transform_indices = @transform_3, window_bounds = array<i64: 1, 64>}, {pipeline_mode = #tpu.pipeline_mode<synchronous>, transform_indices = @transform_4, window_bounds = array<i64: 64, 16>}, {pipeline_mode = #tpu.pipeline_mode<synchronous>, transform_indices = @transform_5, window_bounds = array<i64: 1, 16>}, {pipeline_mode = #tpu.pipeline_mode<synchronous>, transform_indices = @transform_6, window_bounds = array<i64: 1, 16>}, {pipeline_mode = #tpu.pipeline_mode<synchronous>, transform_indices = @transform_7, window_bounds = array<i64: 16, 4>}, {pipeline_mode = #tpu.pipeline_mode<synchronous>, transform_indices = @transform_8, window_bounds = array<i64: 1, 4>}, {pipeline_mode = #tpu.pipeline_mode<synchronous>, transform_indices = @transform_9, window_bounds = array<i64: 1, 4>}, {pipeline_mode = #tpu.pipeline_mode<synchronous>, transform_indices = @transform_10, window_bounds = array<i64: 4, 8>}, {pipeline_mode = #tpu.pipeline_mode<synchronous>, transform_indices = @transform_11, window_bounds = array<i64: 1, 8>}, {transform_indices = @transform_12, window_bounds = array<i64: 8, 8>}]} {
    %c0 = arith.constant 0 : index
    %c0_0 = arith.constant 0 : index
    %0 = vector.load %arg1[%c0, %c0_0] : memref<8x256xf32, #tpu.memory_space<vmem>>, vector<8x256xf32>
    %c0_1 = arith.constant 0 : index
    %c0_2 = arith.constant 0 : index
    %1 = vector.load %arg2[%c0_1, %c0_2] : memref<256x64xf32, #tpu.memory_space<vmem>>, vector<256x64xf32>
    %cst = arith.constant dense<0.000000e+00> : vector<8x64xf32>
    %2 = tpu.matmul %0, %1, %cst {dimension_numbers = #tpu.dot_dimension_numbers<[1], [0], [0], [1], [0, 0, 1, 1], [], []>} : vector<8x256xf32>, vector<256x64xf32>, vector<8x64xf32> -> vector<8x64xf32>
    %c0_3 = arith.constant 0 : index
    %c0_4 = arith.constant 0 : index
    %3 = vector.load %arg3[%c0_3, %c0_4] : memref<1x64xf32, #tpu.memory_space<vmem>>, vector<1x64xf32>
    %4 = vector.broadcast %3 : vector<1x64xf32> to vector<8x64xf32>
    %5 = arith.addf %2, %4 : vector<8x64xf32>
    %c0_5 = arith.constant 0 : index
    %c0_6 = arith.constant 0 : index
    %6 = vector.load %arg4[%c0_5, %c0_6] : memref<1x64xf32, #tpu.memory_space<vmem>>, vector<1x64xf32>
    %7 = arith.mulf %5, %5 : vector<8x64xf32>
    %cst_7 = arith.constant dense<0.000000e+00> : vector<8xf32>
    %8 = vector.multi_reduction <add>, %7, %cst_7 [1] : vector<8x64xf32> to vector<8xf32>
    %9 = vector.shape_cast %8 : vector<8xf32> to vector<8x1xf32>
    %cst_8 = arith.constant 6.400000e+01 : f32
    %10 = vector.broadcast %cst_8 : f32 to vector<8x1xf32>
    %11 = arith.divf %9, %10 : vector<8x1xf32>
    %cst_9 = arith.constant 9.99999997E-7 : f32
    %12 = vector.broadcast %cst_9 : f32 to vector<8x1xf32>
    %13 = arith.addf %11, %12 : vector<8x1xf32>
    %14 = math.rsqrt %13 : vector<8x1xf32>
    %15 = vector.broadcast %14 : vector<8x1xf32> to vector<8x64xf32>
    %16 = arith.mulf %5, %15 : vector<8x64xf32>
    %17 = vector.broadcast %6 : vector<1x64xf32> to vector<8x64xf32>
    %18 = arith.mulf %17, %16 : vector<8x64xf32>
    %cst_10 = arith.constant 5.000000e-01 : f32
    %19 = vector.broadcast %cst_10 : f32 to vector<8x64xf32>
    %20 = arith.mulf %19, %18 : vector<8x64xf32>
    %cst_11 = arith.constant 4.471500e-02 : f32
    %21 = vector.broadcast %cst_11 : f32 to vector<8x64xf32>
    %22 = arith.mulf %21, %18 : vector<8x64xf32>
    %23 = arith.mulf %22, %18 : vector<8x64xf32>
    %24 = arith.mulf %23, %18 : vector<8x64xf32>
    %25 = arith.addf %18, %24 : vector<8x64xf32>
    %cst_12 = arith.constant 0.797884583 : f32
    %26 = vector.broadcast %cst_12 : f32 to vector<8x64xf32>
    %27 = arith.mulf %26, %25 : vector<8x64xf32>
    %28 = math.tanh %27 : vector<8x64xf32>
    %cst_13 = arith.constant 1.000000e+00 : f32
    %29 = vector.broadcast %cst_13 : f32 to vector<8x64xf32>
    %30 = arith.addf %29, %28 : vector<8x64xf32>
    %31 = arith.mulf %20, %30 : vector<8x64xf32>
    %c0_14 = arith.constant 0 : index
    %c0_15 = arith.constant 0 : index
    %32 = vector.load %arg5[%c0_14, %c0_15] : memref<64x16xf32, #tpu.memory_space<vmem>>, vector<64x16xf32>
    %cst_16 = arith.constant dense<0.000000e+00> : vector<8x16xf32>
    %33 = tpu.matmul %31, %32, %cst_16 {dimension_numbers = #tpu.dot_dimension_numbers<[1], [0], [0], [1], [0, 0, 1, 1], [], []>} : vector<8x64xf32>, vector<64x16xf32>, vector<8x16xf32> -> vector<8x16xf32>
    %c0_17 = arith.constant 0 : index
    %c0_18 = arith.constant 0 : index
    %34 = vector.load %arg6[%c0_17, %c0_18] : memref<1x16xf32, #tpu.memory_space<vmem>>, vector<1x16xf32>
    %35 = vector.broadcast %34 : vector<1x16xf32> to vector<8x16xf32>
    %36 = arith.addf %33, %35 : vector<8x16xf32>
    %c0_19 = arith.constant 0 : index
    %c0_20 = arith.constant 0 : index
    %37 = vector.load %arg7[%c0_19, %c0_20] : memref<1x16xf32, #tpu.memory_space<vmem>>, vector<1x16xf32>
    %38 = arith.mulf %36, %36 : vector<8x16xf32>
    %cst_21 = arith.constant dense<0.000000e+00> : vector<8xf32>
    %39 = vector.multi_reduction <add>, %38, %cst_21 [1] : vector<8x16xf32> to vector<8xf32>
    %40 = vector.shape_cast %39 : vector<8xf32> to vector<8x1xf32>
    %cst_22 = arith.constant 1.600000e+01 : f32
    %41 = vector.broadcast %cst_22 : f32 to vector<8x1xf32>
    %42 = arith.divf %40, %41 : vector<8x1xf32>
    %cst_23 = arith.constant 9.99999997E-7 : f32
    %43 = vector.broadcast %cst_23 : f32 to vector<8x1xf32>
    %44 = arith.addf %42, %43 : vector<8x1xf32>
    %45 = math.rsqrt %44 : vector<8x1xf32>
    %46 = vector.broadcast %45 : vector<8x1xf32> to vector<8x16xf32>
    %47 = arith.mulf %36, %46 : vector<8x16xf32>
    %48 = vector.broadcast %37 : vector<1x16xf32> to vector<8x16xf32>
    %49 = arith.mulf %48, %47 : vector<8x16xf32>
    %cst_24 = arith.constant 5.000000e-01 : f32
    %50 = vector.broadcast %cst_24 : f32 to vector<8x16xf32>
    %51 = arith.mulf %50, %49 : vector<8x16xf32>
    %cst_25 = arith.constant 4.471500e-02 : f32
    %52 = vector.broadcast %cst_25 : f32 to vector<8x16xf32>
    %53 = arith.mulf %52, %49 : vector<8x16xf32>
    %54 = arith.mulf %53, %49 : vector<8x16xf32>
    %55 = arith.mulf %54, %49 : vector<8x16xf32>
    %56 = arith.addf %49, %55 : vector<8x16xf32>
    %cst_26 = arith.constant 0.797884583 : f32
    %57 = vector.broadcast %cst_26 : f32 to vector<8x16xf32>
    %58 = arith.mulf %57, %56 : vector<8x16xf32>
    %59 = math.tanh %58 : vector<8x16xf32>
    %cst_27 = arith.constant 1.000000e+00 : f32
    %60 = vector.broadcast %cst_27 : f32 to vector<8x16xf32>
    %61 = arith.addf %60, %59 : vector<8x16xf32>
    %62 = arith.mulf %51, %61 : vector<8x16xf32>
    %c0_28 = arith.constant 0 : index
    %c0_29 = arith.constant 0 : index
    %63 = vector.load %arg8[%c0_28, %c0_29] : memref<16x4xf32, #tpu.memory_space<vmem>>, vector<16x4xf32>
    %cst_30 = arith.constant dense<0.000000e+00> : vector<8x4xf32>
    %64 = tpu.matmul %62, %63, %cst_30 {dimension_numbers = #tpu.dot_dimension_numbers<[1], [0], [0], [1], [0, 0, 1, 1], [], []>} : vector<8x16xf32>, vector<16x4xf32>, vector<8x4xf32> -> vector<8x4xf32>
    %c0_31 = arith.constant 0 : index
    %c0_32 = arith.constant 0 : index
    %65 = vector.load %arg9[%c0_31, %c0_32] : memref<1x4xf32, #tpu.memory_space<vmem>>, vector<1x4xf32>
    %66 = vector.broadcast %65 : vector<1x4xf32> to vector<8x4xf32>
    %67 = arith.addf %64, %66 : vector<8x4xf32>
    %c0_33 = arith.constant 0 : index
    %c0_34 = arith.constant 0 : index
    %68 = vector.load %arg10[%c0_33, %c0_34] : memref<1x4xf32, #tpu.memory_space<vmem>>, vector<1x4xf32>
    %69 = arith.mulf %67, %67 : vector<8x4xf32>
    %cst_35 = arith.constant dense<0.000000e+00> : vector<8xf32>
    %70 = vector.multi_reduction <add>, %69, %cst_35 [1] : vector<8x4xf32> to vector<8xf32>
    %71 = vector.shape_cast %70 : vector<8xf32> to vector<8x1xf32>
    %cst_36 = arith.constant 4.000000e+00 : f32
    %72 = vector.broadcast %cst_36 : f32 to vector<8x1xf32>
    %73 = arith.divf %71, %72 : vector<8x1xf32>
    %cst_37 = arith.constant 9.99999997E-7 : f32
    %74 = vector.broadcast %cst_37 : f32 to vector<8x1xf32>
    %75 = arith.addf %73, %74 : vector<8x1xf32>
    %76 = math.rsqrt %75 : vector<8x1xf32>
    %77 = vector.broadcast %76 : vector<8x1xf32> to vector<8x4xf32>
    %78 = arith.mulf %67, %77 : vector<8x4xf32>
    %79 = vector.broadcast %68 : vector<1x4xf32> to vector<8x4xf32>
    %80 = arith.mulf %79, %78 : vector<8x4xf32>
    %cst_38 = arith.constant 5.000000e-01 : f32
    %81 = vector.broadcast %cst_38 : f32 to vector<8x4xf32>
    %82 = arith.mulf %81, %80 : vector<8x4xf32>
    %cst_39 = arith.constant 4.471500e-02 : f32
    %83 = vector.broadcast %cst_39 : f32 to vector<8x4xf32>
    %84 = arith.mulf %83, %80 : vector<8x4xf32>
    %85 = arith.mulf %84, %80 : vector<8x4xf32>
    %86 = arith.mulf %85, %80 : vector<8x4xf32>
    %87 = arith.addf %80, %86 : vector<8x4xf32>
    %cst_40 = arith.constant 0.797884583 : f32
    %88 = vector.broadcast %cst_40 : f32 to vector<8x4xf32>
    %89 = arith.mulf %88, %87 : vector<8x4xf32>
    %90 = math.tanh %89 : vector<8x4xf32>
    %cst_41 = arith.constant 1.000000e+00 : f32
    %91 = vector.broadcast %cst_41 : f32 to vector<8x4xf32>
    %92 = arith.addf %91, %90 : vector<8x4xf32>
    %93 = arith.mulf %82, %92 : vector<8x4xf32>
    %c0_42 = arith.constant 0 : index
    %c0_43 = arith.constant 0 : index
    %94 = vector.load %arg11[%c0_42, %c0_43] : memref<4x8xf32, #tpu.memory_space<vmem>>, vector<4x8xf32>
    %cst_44 = arith.constant dense<0.000000e+00> : vector<8x8xf32>
    %95 = tpu.matmul %93, %94, %cst_44 {dimension_numbers = #tpu.dot_dimension_numbers<[1], [0], [0], [1], [0, 0, 1, 1], [], []>} : vector<8x4xf32>, vector<4x8xf32>, vector<8x8xf32> -> vector<8x8xf32>
    %c0_45 = arith.constant 0 : index
    %c0_46 = arith.constant 0 : index
    %96 = vector.load %arg12[%c0_45, %c0_46] : memref<1x8xf32, #tpu.memory_space<vmem>>, vector<1x8xf32>
    %97 = vector.broadcast %96 : vector<1x8xf32> to vector<8x8xf32>
    %98 = arith.addf %95, %97 : vector<8x8xf32>
    %c0_47 = arith.constant 0 : index
    %c0_48 = arith.constant 0 : index
    %99 = vector.load %arg13[%c0_47, %c0_48] : memref<8x8xf32, #tpu.memory_space<vmem>>, vector<8x8xf32>
    tpu.vector_store %arg13[%c0_47, %c0_48], %98 {strides = array<i32>} : memref<8x8xf32, #tpu.memory_space<vmem>>, vector<8x8xf32>,
    return
  }
  func.func @transform_0(%arg0: i32) -> (i32, i32) {
    %c0_i32 = arith.constant 0 : i32
    %c0_i32_0 = arith.constant 0 : i32
    return %arg0, %c0_i32 : i32, i32
  }
  func.func @transform_1(%arg0: i32) -> (i32, i32) {
    %c0_i32 = arith.constant 0 : i32
    %c0_i32_0 = arith.constant 0 : i32
    %c0_i32_1 = arith.constant 0 : i32
    return %c0_i32, %c0_i32_0 : i32, i32
  }
  func.func @transform_2(%arg0: i32) -> (i32, i32) {
    %c0_i32 = arith.constant 0 : i32
    %c0_i32_0 = arith.constant 0 : i32
    %c0_i32_1 = arith.constant 0 : i32
    return %c0_i32, %c0_i32_0 : i32, i32
  }
  func.func @transform_3(%arg0: i32) -> (i32, i32) {
    %c0_i32 = arith.constant 0 : i32
    %c0_i32_0 = arith.constant 0 : i32
    %c0_i32_1 = arith.constant 0 : i32
    return %c0_i32, %c0_i32_0 : i32, i32
  }
  func.func @transform_4(%arg0: i32) -> (i32, i32) {
    %c0_i32 = arith.constant 0 : i32
    %c0_i32_0 = arith.constant 0 : i32
    %c0_i32_1 = arith.constant 0 : i32
    return %c0_i32, %c0_i32_0 : i32, i32
  }
  func.func @transform_5(%arg0: i32) -> (i32, i32) {
    %c0_i32 = arith.constant 0 : i32
    %c0_i32_0 = arith.constant 0 : i32
    %c0_i32_1 = arith.constant 0 : i32
    return %c0_i32, %c0_i32_0 : i32, i32
  }
  func.func @transform_6(%arg0: i32) -> (i32, i32) {
    %c0_i32 = arith.constant 0 : i32
    %c0_i32_0 = arith.constant 0 : i32
    %c0_i32_1 = arith.constant 0 : i32
    return %c0_i32, %c0_i32_0 : i32, i32
  }
  func.func @transform_7(%arg0: i32) -> (i32, i32) {
    %c0_i32 = arith.constant 0 : i32
    %c0_i32_0 = arith.constant 0 : i32
    %c0_i32_1 = arith.constant 0 : i32
    return %c0_i32, %c0_i32_0 : i32, i32
  }
  func.func @transform_8(%arg0: i32) -> (i32, i32) {
    %c0_i32 = arith.constant 0 : i32
    %c0_i32_0 = arith.constant 0 : i32
    %c0_i32_1 = arith.constant 0 : i32
    return %c0_i32, %c0_i32_0 : i32, i32
  }
  func.func @transform_9(%arg0: i32) -> (i32, i32) {
    %c0_i32 = arith.constant 0 : i32
    %c0_i32_0 = arith.constant 0 : i32
    %c0_i32_1 = arith.constant 0 : i32
    return %c0_i32, %c0_i32_0 : i32, i32
  }
  func.func @transform_10(%arg0: i32) -> (i32, i32) {
    %c0_i32 = arith.constant 0 : i32
    %c0_i32_0 = arith.constant 0 : i32
    %c0_i32_1 = arith.constant 0 : i32
    return %c0_i32, %c0_i32_0 : i32, i32
  }
  func.func @transform_11(%arg0: i32) -> (i32, i32) {
    %c0_i32 = arith.constant 0 : i32
    %c0_i32_0 = arith.constant 0 : i32
    %c0_i32_1 = arith.constant 0 : i32
    return %c0_i32, %c0_i32_0 : i32, i32
  }
  func.func @transform_12(%arg0: i32) -> (i32, i32) {
    %c0_i32 = arith.constant 0 : i32
    %c0_i32_0 = arith.constant 0 : i32
    return %arg0, %c0_i32 : i32, i32
  }
}

</mosaic_0001>

<bundles_post_ra>
// kernel: tpu_custom_call.1
= control target key start
LH: loop header
LB: loop body
LE: loop exit
PB: predicated region body
PF: predicated region fallthrough
CT: control target
= control target key end

     0   :  { %s1162_s21 = smov 0   ;;  %s1350_s0 = inlined_call_operand.vmem [shape: f32[16,256], index: 0, kind: input, shape index: {}]   ;;  %s1351_s1 = inlined_call_operand.vmem [shape: f32[256,64], index: 1, kind: input, shape index: {}]   ;;  %s1352_s2 = inlined_call_operand.vmem [shape: f32[1,64], index: 2, kind: input, shape index: {}]   ;;  %s1353_s3 = inlined_call_operand.vmem [shape: f32[1,64], index: 3, kind: input, shape index: {}]   ;;  %s1354_s4 = inlined_call_operand.vmem [shape: f32[64,16], index: 4, kind: input, shape index: {}]   ;;  %s1355_s5 = inlined_call_operand.vmem [shape: f32[1,16], index: 5, kind: input, shape index: {}]   ;;  %s1356_s6 = inlined_call_operand.vmem [shape: f32[1,16], index: 6, kind: input, shape index: {}]   ;;  %s1357_s7 = inlined_call_operand.vmem [shape: f32[16,4], index: 7, kind: input, shape index: {}]   ;;  %s1358_s8 = inlined_call_operand.vmem [shape: f32[1,4], index: 8, kind: input, shape index: {}]   ;;  %s1359_s9 = inlined_call_operand.vmem [shape: f32[1,4], index: 9, kind: input, shape index: {}]   ;;  %s1360_s10 = inlined_call_operand.vmem [shape: f32[4,8], index: 10, kind: input, shape index: {}]   ;;  %s1361_s11 = inlined_call_operand.vmem [shape: f32[1,8], index: 11, kind: input, shape index: {}]   ;;  %s1362_s12 = inlined_call_operand.vmem [shape: f32[16,8], index: 12, kind: output, shape index: {}]  }
   0x1 LB: > { %s914_s22 = sadd.s32 4294967295, %s1092_s21   ;;  %p918_p0 = scmp.ge.s32.totalorder %s1092_s21, 1  ;;  %s1092_s21 = sphi %s1162_s21, %s22_s21  }
   0x2   : > { %p362_p1 = scmp.lt.s32.totalorder %s1092_s21, 3 }
   0x4   : > { %p363_p2 = pnand %p918_p0, %p362_p1 }
   0x5   : > { %v430_v0 = vld [vmem:[%s1351_s1 + $0x80] sm:$0xff] (!%p363_p2)  ;;  %v431_v1 = vld [vmem:[%s1351_s1 + $0x88] sm:$0xff] (!%p363_p2)  ;;  %p403_p3 = scmp.lt.s32.totalorder (!%p363_p2), %s914_s22, 1  ;;  %v432_v5 = vld [vmem:[%s1351_s1 + $0x90] sm:$0xff] (!%p363_p2)  ;;  %vm525_vm0 = vcmask (!%p363_p2), 523264   ;;  %v1094_v60 = vmov (!%p363_p2), 0.0|0.0  }
   0x6   : > { %366 = sbr.rel (%p363_p2) target bundleno = 1467 (0x5bb), region = 68  ;;  %v414_v2 = vld [vmem:[%s1351_s1] sm:$0xff] (!%p363_p2)  ;;  %v1016_v3 = vpack.c.bf16 (!%p363_p2), %v431_v1, %v430_v0  ;;  %v415_v4 = vld [vmem:[%s1351_s1 + $0x8] sm:$0xff] (!%p363_p2)  ;;  %v433_v6 = vld [vmem:[%s1351_s1 + $0x98] sm:$0xff] (!%p363_p2)  ;;  %1048 = vmatprep.subr.bf16.mxu1 (!%p363_p2), %v1094_v60  ;;  %vm1095_vm1 = vmmov (!%p363_p2), 0   ;;  %v1096_v63 = vmov (!%p363_p2), 0.0  }
   0x7   : > { %v1018_v7 = vpack.c.bf16 (!%p363_p2), %v415_v4, %v414_v2  ;;  %v1020_v8 = vpack.c.bf16 (!%p363_p2), %v433_v6, %v432_v5  ;;  %v416_v9 = vld [vmem:[%s1351_s1 + $0x10] sm:$0xff] (!%p363_p2)  ;;  %v417_v10 = vld [vmem:[%s1351_s1 + $0x18] sm:$0xff] (!%p363_p2)  ;;  %v434_v11 = vld [vmem:[%s1351_s1 + $0xa0] sm:$0xff] (!%p363_p2)  ;;  %1001 = vmatprep.mubr.msk.f32.mxu1 (!%p363_p2), %vm1095_vm1, %v1096_v63  ;;  %vm640_vm2 = vcmask (!%p363_p2), 130048   ;;  %vm749_vm3 = vcmask (!%p363_p2), 31744  }
   0x8   : > { %1017 = vmatprep.subr.bf16.mxu0 (!%p363_p2), %v1016_v3  ;;  %v435_v12 = vld [vmem:[%s1351_s1 + $0xa8] sm:$0xff] (!%p363_p2)  ;;  %v1022_v13 = vpack.c.bf16 (!%p363_p2), %v417_v10, %v416_v9  ;;  %v418_v15 = vld [vmem:[%s1351_s1 + $0x20] sm:$0xff] (!%p363_p2)  ;;  %v436_v17 = vld [vmem:[%s1351_s1 + $0xb0] sm:$0xff] (!%p363_p2)  ;;  %vm785_vm4 = vcmask (!%p363_p2), 1043456   ;;  %vm859_vm5 = vcmask (!%p363_p2), 64512  }
   0x9   : > { %1019 = vmatpush3.bf16.msra.mxu0 (!%p363_p2), %v1018_v7  ;;  %v1024_v14 = vpack.c.bf16 (!%p363_p2), %v435_v12, %v434_v11  ;;  %v419_v16 = vld [vmem:[%s1351_s1 + $0x28] sm:$0xff] (!%p363_p2)  ;;  %v437_v18 = vld [vmem:[%s1351_s1 + $0xb8] sm:$0xff] (!%p363_p2)  ;;  %v420_v21 = vld [vmem:[%s1351_s1 + $0x30] sm:$0xff] (!%p363_p2) }
   0xa   : > { %1021 = vmatprep.subr.bf16.mxu0 (!%p363_p2), %v1020_v8  ;;  %v1026_v19 = vpack.c.bf16 (!%p363_p2), %v419_v16, %v418_v15  ;;  %v1028_v20 = vpack.c.bf16 (!%p363_p2), %v437_v18, %v436_v17  ;;  %v421_v22 = vld [vmem:[%s1351_s1 + $0x38] sm:$0xff] (!%p363_p2)  ;;  %v438_v23 = vld [vmem:[%s1351_s1 + $0xc0] sm:$0xff] (!%p363_p2)  ;;  %v439_v24 = vld [vmem:[%s1351_s1 + $0xc8] sm:$0xff] (!%p363_p2) }
   0xb   : > { %v1030_v26 = vpack.c.bf16 (!%p363_p2), %v421_v22, %v420_v21  ;;  %v1032_v27 = vpack.c.bf16 (!%p363_p2), %v439_v24, %v438_v23  ;;  %v422_v28 = vld [vmem:[%s1351_s1 + $0x40] sm:$0xff] (!%p363_p2)  ;;  %v423_v29 = vld [vmem:[%s1351_s1 + $0x48] sm:$0xff] (!%p363_p2)  ;;  %v440_v30 = vld [vmem:[%s1351_s1 + $0xd0] sm:$0xff] (!%p363_p2) }
   0xc   : > { %v441_v31 = vld [vmem:[%s1351_s1 + $0xd8] sm:$0xff] (!%p363_p2)  ;;  %v1034_v32 = vpack.c.bf16 (!%p363_p2), %v423_v29, %v422_v28  ;;  %v424_v34 = vld [vmem:[%s1351_s1 + $0x50] sm:$0xff] (!%p363_p2)  ;;  %v442_v36 = vld [vmem:[%s1351_s1 + $0xe0] sm:$0xff] (!%p363_p2) }
   0xd   : > { %s1364_s22 = smov (!%p403_p3, %s914_s22), 1  ;;  %1023 = vmatpush3.bf16.msra.mxu0 %v1022_v13  ;;  %v1036_v33 = vpack.c.bf16 %v441_v31, %v440_v30  ;;  %v425_v35 = vld [vmem:[%s1351_s1 + $0x58] sm:$0xff]  ;;  %v443_v37 = vld [vmem:[%s1351_s1 + $0xe8] sm:$0xff]  ;;  %v426_v40 = vld [vmem:[%s1351_s1 + $0x60] sm:$0xff] }
   0xe   : > { %s935_s27 = sshll.u32 %s1364_s22, 4  ;;  %1025 = vmatprep.subr.bf16.mxu0 %v1024_v14  ;;  %v1038_v38 = vpack.c.bf16 %v425_v35, %v424_v34  ;;  %v1040_v39 = vpack.c.bf16 %v443_v37, %v442_v36  ;;  %v427_v41 = vld [vmem:[%s1351_s1 + $0x68] sm:$0xff]  ;;  %v444_v42 = vld [vmem:[%s1351_s1 + $0xf0] sm:$0xff]  ;;  %v445_v43 = vld [vmem:[%s1351_s1 + $0xf8] sm:$0xff]  ;;  %s921_s13 = sshll.u32 %s1364_s22, 3 }
   0xf   : > { %s1218_s20 = scalar_lea.vmem %s1350_s0, %s935_s27  ;;  %v1042_v44 = vpack.c.bf16 %v427_v41, %v426_v40  ;;  %v1044_v45 = vpack.c.bf16 %v445_v43, %v444_v42  ;;  %v428_v46 = vld [vmem:[%s1351_s1 + $0x70] sm:$0xff]  ;;  %v429_v47 = vld [vmem:[%s1351_s1 + $0x78] sm:$0xff]  ;;  %v922_v51 = vld [vmem:[%s1352_s2] ss:$0 sm:$0xff]  ;;  %s411_s17 = scalar_lea.vmem %s1362_s12, %s921_s13 }
  0x10   : > { %v413_v25 = vld [vmem:[%s1218_s20 + $0x8] sm:$0xff]  ;;  %v1046_v48 = vpack.c.bf16 %v429_v47, %v428_v46  ;;  %v412_v49 = vld [vmem:[%s1218_s20] sm:$0xff]  ;;  %v552_v59 = vld [vmem:[%s1354_s4 + $0x10] sm:$0xff] }
  0x11   : > { %517 = vmatprep.mubr.f32.mxu0 %v413_v25  ;;  %1027 = vmatpush3.bf16.msra.mxu0 %v1026_v19  ;;  %v550_v57 = vld [vmem:[%s1354_s4] sm:$0xff]  ;;  %v551_v58 = vld [vmem:[%s1354_s4 + $0x8] sm:$0xff]  ;;  %v553_v62 = vld [vmem:[%s1354_s4 + $0x18] sm:$0xff] }
  0x12   : > { %1029 = vmatprep.subr.bf16.mxu0 %v1028_v20  ;;  %v1049_v61 = vpack.c.bf16 %v551_v58, %v550_v57  ;;  %v1052_v0 = vpack.c.bf16 %v553_v62, %v552_v59  ;;  %v554_v1 = vld [vmem:[%s1354_s4 + $0x20] sm:$0xff]  ;;  %v555_v2 = vld [vmem:[%s1354_s4 + $0x28] sm:$0xff]  ;;  %v556_v4 = vld [vmem:[%s1354_s4 + $0x30] sm:$0xff] }
  0x13   : > { %v1055_v3 = vpack.c.bf16 %v555_v2, %v554_v1  ;;  %v557_v5 = vld [vmem:[%s1354_s4 + $0x38] sm:$0xff]  ;;  %v923_v11 = vld [vmem:[%s1353_s3] ss:$0 sm:$0xff]  ;;  %v666_v30 = vld [vmem:[%s1357_s7 + $0x8] sm:$0xff] }
  0x14   : > { %1050 = vmatpush3.bf16.msra.mxu1 %v1049_v61  ;;  %v1058_v6 = vpack.c.bf16 %v557_v5, %v556_v4  ;;  %v924_v23 = vld [vmem:[%s1355_s5] ss:$0 sm:$0xff] }
  0x15   : > { %1031 = vmatpush3.bf16.msra.mxu0 %v1030_v26  ;;  %1051 = vmatprep.subr.bf16.mxu1 %v1094_v60  ;;  %v665_v29 = vld [vmem:[%s1357_s7] sm:$0xff] }
  0x16   : > { %1033 = vmatprep.subr.bf16.mxu0 %v1032_v27  ;;  %v1061_v31 = vpack.c.bf16 %v666_v30, %v665_v29  ;;  %v926_v36 = vld [vmem:[%s1356_s6] ss:$0 sm:$0xff] }
  0x17   : > { %v929_v59 = vld [vmem:[%s1359_s9] ss:$0 sm:$0xff] }
  0x18   : > { %1053 = vmatpush3.bf16.msra.mxu1 %v1052_v0 }
  0x19   : > { %1035 = vmatpush3.bf16.msra.mxu0 %v1034_v32  ;;  %1054 = vmatprep.subr.bf16.mxu1 %v1094_v60 }
  0x1a   : > { %1037 = vmatprep.subr.bf16.mxu0 %v1036_v33 }
  0x1c   : > { %1056 = vmatpush3.bf16.msra.mxu1 %v1055_v3 }
  0x1d   : > { %1039 = vmatpush3.bf16.msra.mxu0 %v1038_v38  ;;  %1057 = vmatprep.subr.bf16.mxu1 %v1094_v60 }
  0x1e   : > { %1041 = vmatprep.subr.bf16.mxu0 %v1040_v39 }
  0x20   : > { %1059 = vmatpush3.bf16.msra.mxu1 %v1058_v6 }
  0x21   : > { %1043 = vmatpush3.bf16.msra.mxu0 %v1042_v44  ;;  %1060 = vmatprep.subr.bf16.mxu1 %v1094_v60 }
  0x22   : > { %1045 = vmatprep.subr.bf16.mxu0 %v1044_v45 }
  0x25   : > { %1047 = vmatpush3.bf16.msra.mxu0 %v1046_v48  ;;  %v927_v48 = vld [vmem:[%s1358_s8] ss:$0 sm:$0xff] }
  0x28   : > { %518 = vmatmul.mubr.f32.vlgmr.msra.gmra.mrb[0].mxu0 %v412_v49 }
  0xfb   : > { %v968_v50 = vpop.f32.mrb[0].mxu0 }
  0xfc   : > { %v969_v52 = vpop.f32.mrb[1].mxu0 }
  0xfd   : > { %v970_v53 = vadd.f32 %v969_v52, %v968_v50 }
  0xff   : > { %v520_v54 = vadd.f32 %v970_v53, %v922_v51 }
 0x101   : > { %v524_v55 = vmul.f32 %v520_v54, %v520_v54 }
 0x103   : > { %v526_v56 = vsel %vm525_vm0, %v524_v55, 0.0 }
 0x104   : > { %527 = vadd.xlane.f32.xlu0 %v526_v56 }
 0x191   : > { %v528_v7 = vpop.xlane.xlu0 %527 }
 0x192   : > { %v530_v8 = vmul.f32 0.015625, %v528_v7  ;;  %v930_v7 = vld [vmem:[%s1361_s11] ss:$0 sm:$0xff] }
 0x194   : > { %v531_v9 = vadd.f32 1e-06, %v530_v8 }
 0x196   : > { %1074 = vrsqrt.f32 %v531_v9 }
 0x1a0   : > { %v1075_v10 = vpop.eup %1074 }
 0x1a1   : > { %v533_v12 = vmul.f32 %v1075_v10, %v520_v54  ;;  %v774_v54 = vld [vmem:[%s1360_s10] sm:$0xf] }
 0x1a3   : > { %v540_v13 = vmul.f32 %v923_v11, %v533_v12 }
 0x1a5   : > { %v542_v14 = vmul.f32 0.044715, %v540_v13  ;;  %v541_v20 = vmul.f32 0.5, %v540_v13 }
 0x1a7   : > { %v543_v15 = vmul.f32 %v542_v14, %v540_v13 }
 0x1a9   : > { %v544_v16 = vmul.f32 %v543_v15, %v540_v13 }
 0x1ab   : > { %v545_v17 = vadd.f32 %v544_v16, %v540_v13 }
 0x1ad   : > { %v546_v18 = vmul.f32 0.7978846, %v545_v17 }
 0x1af   : > { %1076 = vtanh.f32 %v546_v18 }
 0x1b9   : > { %v1077_v19 = vpop.eup %1076 }
 0x1ba   : > { %v548_v21 = vadd.f32 1.0, %v1077_v19 }
 0x1bc   : > { %v549_v22 = vmul.f32 %v548_v21, %v541_v20 }
 0x1be   : > { %1002 = vmatmul.mubr.msk.f32.vlgmr.msra.gmra.mrb[0].mxu1 %vm525_vm0, %v549_v22 }
 0x1bf   : > { %1008 = vmatprep.mubr.msk.f32.mxu1 %vm1095_vm1, %v1096_v63  ;;  %1062 = vmatpush3.bf16.msra.mxu1 %v1061_v31 }
 0x1c0   : > { %1011 = vmatprep.subr.mxu1 %v1096_v63 }
 0x291   : > { %v634_v24 = vpop.f32.mrb[0].mxu1 }
 0x292   : > { %v635_v25 = vadd.f32 %v924_v23, %v634_v24  ;;  %v1003_v26 = vpop.f32.mrb[1].mxu1 }
 0x294   : > { %v639_v27 = vmul.f32 %v635_v25, %v635_v25 }
 0x296   : > { %v641_v28 = vsel %vm640_vm2, %v639_v27, 0.0 }
 0x297   : > { %642 = vadd.xlane.f32.xlu0 %v641_v28 }
 0x324   : > { %v643_v32 = vpop.xlane.xlu0 %642 }
 0x325   : > { %v645_v33 = vmul.f32 0.0625, %v643_v32 }
 0x327   : > { %v646_v34 = vadd.f32 1e-06, %v645_v33 }
 0x329   : > { %1078 = vrsqrt.f32 %v646_v34 }
 0x333   : > { %v1079_v35 = vpop.eup %1078 }
 0x334   : > { %v648_v37 = vmul.f32 %v1079_v35, %v635_v25 }
 0x336   : > { %v655_v38 = vmul.f32 %v926_v36, %v648_v37 }
 0x338   : > { %v657_v39 = vmul.f32 0.044715, %v655_v38  ;;  %v656_v45 = vmul.f32 0.5, %v655_v38 }
 0x33a   : > { %v658_v40 = vmul.f32 %v657_v39, %v655_v38 }
 0x33c   : > { %v659_v41 = vmul.f32 %v658_v40, %v655_v38 }
 0x33e   : > { %v660_v42 = vadd.f32 %v659_v41, %v655_v38 }
 0x340   : > { %v661_v43 = vmul.f32 0.7978846, %v660_v42 }
 0x342   : > { %1080 = vtanh.f32 %v661_v43 }
 0x34c   : > { %v1081_v44 = vpop.eup %1080 }
 0x34d   : > { %v663_v46 = vadd.f32 1.0, %v1081_v44 }
 0x34f   : > { %v664_v47 = vmul.f32 %v663_v46, %v656_v45 }
 0x351   : > { %1009 = vmatmul.mubr.msk.f32.vlgmr.msra.gmra.mrb[2].mxu1 %vm640_vm2, %v664_v47 }
 0x352   : > { %1013 = vmatprep.mubr.msk.f32.mxu1 %vm1095_vm1, %v1096_v63  ;;  %1012 = vmatpush3.msk.msra.mxu1 %vm785_vm4, %v774_v54 }
 0x424   : > { %v743_v49 = vpop.f32.mrb[2].mxu1 }
 0x425   : > { %v744_v50 = vadd.f32 %v927_v48, %v743_v49  ;;  %v1010_v51 = vpop.f32.mrb[3].mxu1 }
 0x427   : > { %v748_v52 = vmul.f32 %v744_v50, %v744_v50 }
 0x429   : > { %v750_v53 = vsel %vm749_vm3, %v748_v52, 0.0 }
 0x42a   : > { %751 = vadd.xlane.f32.xlu1 %v750_v53 }
 0x4b7   : > { %v752_v55 = vpop.xlane.xlu1 %751 }
 0x4b8   : > { %v754_v56 = vmul.f32 0.25, %v752_v55 }
 0x4ba   : > { %v755_v57 = vadd.f32 1e-06, %v754_v56 }
 0x4bc   : > { %1082 = vrsqrt.f32 %v755_v57 }
 0x4c6   : > { %v1083_v58 = vpop.eup %1082 }
 0x4c7   : > { %v757_v60 = vmul.f32 %v1083_v58, %v744_v50 }
 0x4c9   : > { %v764_v61 = vmul.f32 %v929_v59, %v757_v60 }
 0x4cb   : > { %v766_v62 = vmul.f32 0.044715, %v764_v61  ;;  %v765_v4 = vmul.f32 0.5, %v764_v61 }
 0x4cd   : > { %v767_v63 = vmul.f32 %v766_v62, %v764_v61 }
 0x4cf   : > { %v768_v0 = vmul.f32 %v767_v63, %v764_v61 }
 0x4d1   : > { %v769_v1 = vadd.f32 %v768_v0, %v764_v61 }
 0x4d3   : > { %v770_v2 = vmul.f32 0.7978846, %v769_v1 }
 0x4d5   : > { %1084 = vtanh.f32 %v770_v2 }
 0x4df   : > { %v1085_v3 = vpop.eup %1084 }
 0x4e0   : > { %v772_v5 = vadd.f32 1.0, %v1085_v3 }
 0x4e2   : > { %v773_v6 = vmul.f32 %v772_v5, %v765_v4 }
 0x4e4   : > { %1014 = vmatmul.mubr.msk.f32.vlgmr.msra.gmra.mrb[4].mxu1 %vm749_vm3, %v773_v6 }
 0x5b7   : > { %v855_v8 = vpop.f32.mrb[4].mxu1 }
 0x5b8   : > { %v856_v9 = vadd.f32 %v930_v7, %v855_v8  ;;  %v1015_v10 = vpop.f32.mrb[5].mxu1 }
 0x5ba   : > { %860 = vst.msk [vmem:[%s411_s17] sm:$0xff] %vm859_vm5, %v856_v9 }
 0x5bb PF: > { %s22_s21 = sadd.s32 1, %s1092_s21  }
 0x5bc   : > { %p19_p4 = scmp.ge.s32.totalorder %s22_s21, 4  }
 0x5be   :  { %21 = sbr.rel (!%p19_p4) target bundleno = 1 (0x1), region = 98 }

</bundles_post_ra>
